<compile_context>
chip_gen: v6e
topology: v6e:2x2x1
jax: 0.10.0
libtpu: 0.0.40
codegen_flags: <defaults>
</compile_context>

<pallas_src>
import functools

import jax
import jax.numpy as jnp
from jax.experimental import pallas as pl
from jax.experimental.pallas import tpu as pltpu

HIDDEN = 1024        # fixed by nn.Linear(1024, 256)
MID = 256
NUM_CLASSES = 6
OUT_PAD = 128        # pad tiny class dim to one lane-width (unmasked stores)
DROPOUT_P = 0.1

MAX_TM_BF16 = 2048   # row-tile cap for bf16 activations (~8 MiB dbl-buffered x)
MAX_TM_F32 = 1024    # row-tile cap for f32 activations  (~8 MiB dbl-buffered x)
VMEM_LIMIT_BYTES = 48 * 1024 * 1024   # explicit scoped VMEM; safe on v5e/v6e/v7x


def _head_kernel(seed_ref,                  # scalar-prefetch (SMEM): PRNG seed
                 x_ref,                     # [TM, HIDDEN] activations (bf16 or f32)
                 w1_ref, b1_ref,            # [HIDDEN, MID] bf16, [1, MID] f32
                 w2_ref, b2_ref,            # [MID, OUT_PAD] bf16, [1, OUT_PAD] f32
                 o_ref,                     # [TM, OUT_PAD] bf16
                 *, keep_prob, training):
    # Cast is a no-op when the producer already emits bf16 (preferred path).
    x = x_ref[...].astype(jnp.bfloat16)

    # --- nn.Dropout(p) -- training semantics only; identity in eval ---------
    if training and keep_prob < 1.0:
        # Two seed words (seed, tile index) -> decorrelated per-tile streams.
        pltpu.prng_seed(seed_ref[0], pl.program_id(0))
        bits = pltpu.bitcast(pltpu.prng_random_bits(x.shape), jnp.uint32)
        threshold = jnp.uint32(int(keep_prob * 4294967296.0) - 1)
        # Fold 1/keep_prob into the mask: one bf16 multiply over the tile.
        scale = jnp.where(bits <= threshold,
                          jnp.bfloat16(1.0 / keep_prob), jnp.bfloat16(0.0))
        x = x * scale

    # --- Linear(1024, 256) + ReLU  (bf16 MXU operands, f32 accumulate) ------
    h = jnp.dot(x, w1_ref[...], preferred_element_type=jnp.float32) + b1_ref[...]
    h = jnp.maximum(h, 0.0)

    # --- Linear(256, 6), weights zero-padded to 128 lanes; bf16 writeback ---
    o = jnp.dot(h.astype(jnp.bfloat16), w2_ref[...],
                preferred_element_type=jnp.float32) + b2_ref[...]
    o_ref[...] = o.astype(jnp.bfloat16)


def _round_up(v, m):
    return ((v + m - 1) // m) * m


def _pick_tm(M, max_tm):
    """Row-tile size: >=2 grid steps when possible (v7x megacore), capped at max_tm."""
    if M <= 8:
        return M                                  # full-extent block (always legal)
    if M <= 2 * max_tm:
        return min(_round_up(pl.cdiv(M, 2), 8), _round_up(M, 8))
    return max_tm


def feedback_head(x, params, *, seed=0, dropout_p=DROPOUT_P, training=False):
    """x: [B, S, HIDDEN] hidden states (bf16 preferred, f32 accepted).

    Returns logits [B, S, NUM_CLASSES] in f32 (values at bf16 precision).
    """
    w1b, b1r, w2p, b2p = params
    B, S, H = x.shape
    assert H == HIDDEN
    M = B * S
    x2d = x.reshape(M, H)

    max_tm = MAX_TM_BF16 if x.dtype == jnp.bfloat16 else MAX_TM_F32
    TM = _pick_tm(M, max_tm)
    grid = (pl.cdiv(M, TM),)

    seed_arr = jnp.array([seed], dtype=jnp.int32)
    keep_prob = 1.0 - float(dropout_p)

    grid_spec = pltpu.PrefetchScalarGridSpec(
        num_scalar_prefetch=1,
        grid=grid,
        in_specs=[
            pl.BlockSpec((TM, HIDDEN), lambda i, seed: (i, 0)),     # activations
            pl.BlockSpec((HIDDEN, MID), lambda i, seed: (0, 0)),    # w1 (resident)
            pl.BlockSpec((1, MID), lambda i, seed: (0, 0)),         # b1
            pl.BlockSpec((MID, OUT_PAD), lambda i, seed: (0, 0)),   # w2 (resident)
            pl.BlockSpec((1, OUT_PAD), lambda i, seed: (0, 0)),     # b2
        ],
        out_specs=pl.BlockSpec((TM, OUT_PAD), lambda i, seed: (i, 0)),
    )

    out_padded = pl.pallas_call(
        functools.partial(_head_kernel, keep_prob=keep_prob, training=training),
        out_shape=jax.ShapeDtypeStruct((M, OUT_PAD), jnp.bfloat16),
        grid_spec=grid_spec,
        compiler_params=pltpu.CompilerParams(
            dimension_semantics=("parallel",),          # megacore sharding on v7x
            vmem_limit_bytes=VMEM_LIMIT_BYTES),
    )(seed_arr, x2d, w1b, b1r, w2p, b2p)

    # Tiny slice + cast back to f32 for a PyTorch-like logits dtype.
    return out_padded[:, :NUM_CLASSES].astype(jnp.float32).reshape(B, S, NUM_CLASSES)


def init_params(key):
    """PyTorch-Linear-style init; returns kernel-ready (pre-padded, pre-cast) params."""
    k1, k2, k3, k4 = jax.random.split(key, 4)
    lim1 = 1.0 / (HIDDEN ** 0.5)
    lim2 = 1.0 / (MID ** 0.5)
    w1 = jax.random.uniform(k1, (HIDDEN, MID), jnp.float32, -lim1, lim1)
    b1 = jax.random.uniform(k2, (MID,), jnp.float32, -lim1, lim1)
    w2 = jax.random.uniform(k3, (MID, NUM_CLASSES), jnp.float32, -lim2, lim2)
    b2 = jax.random.uniform(k4, (NUM_CLASSES,), jnp.float32, -lim2, lim2)

    # One-time preparation (hoisted out of the per-call path):
    w1b = w1.astype(jnp.bfloat16)                                   # bf16 MXU operand
    b1r = b1.reshape(1, MID)                                        # f32 bias add
    w2p = jnp.zeros((MID, OUT_PAD), jnp.bfloat16).at[:, :NUM_CLASSES].set(
        w2.astype(jnp.bfloat16))
    b2p = jnp.zeros((1, OUT_PAD), jnp.float32).at[:, :NUM_CLASSES].set(b2)
    return w1b, b1r, w2p, b2p


if __name__ == "__main__":
    key = jax.random.PRNGKey(0)
    kx, kp = jax.random.split(key)

    B, S = 2, 8  # small batch / sequence; hidden size fixed at 1024 by the module
    # Simulated backbone output: producer emits bf16 hidden states (fast path).
    x = jax.random.normal(kx, (B, S, HIDDEN), jnp.float32).astype(jnp.bfloat16)
    params = init_params(kp)

    # Eval-mode forward (PyTorch .eval(): dropout is identity).
    logits = feedback_head(x, params, seed=0, training=False)
    jax.block_until_ready(logits)

    assert logits.shape == (B, S, NUM_CLASSES)
    assert logits.dtype == jnp.float32
    assert bool(jnp.all(jnp.isfinite(logits)))
    print("KERNEL_OK")
</pallas_src>

<mosaic_0001>
module attributes {stable_mosaic.version = 11 : i64} {
  func.func @_head_kernel(%arg0: i32, %arg1: memref<1xi32, #tpu.memory_space<smem>>, %arg2: memref<8x1024xbf16, #tpu.memory_space<vmem>>, %arg3: memref<1024x256xbf16, #tpu.memory_space<vmem>>, %arg4: memref<1x256xf32, #tpu.memory_space<vmem>>, %arg5: memref<256x128xbf16, #tpu.memory_space<vmem>>, %arg6: memref<1x128xf32, #tpu.memory_space<vmem>>, %arg7: memref<8x128xbf16, #tpu.memory_space<vmem>>) attributes {dimension_semantics = [#tpu.dimension_semantics<parallel>], iteration_bounds = array<i64: 2>, scalar_prefetch = 1 : i64, scratch_operands = 0 : i64, tpu.core_type = #tpu.core_type<tc>, window_params = [{transform_indices = @transform_0, window_bounds = array<i64: 8, 1024>}, {pipeline_mode = #tpu.pipeline_mode<synchronous>, transform_indices = @transform_1, window_bounds = array<i64: 1024, 256>}, {pipeline_mode = #tpu.pipeline_mode<synchronous>, transform_indices = @transform_2, window_bounds = array<i64: 1, 256>}, {pipeline_mode = #tpu.pipeline_mode<synchronous>, transform_indices = @transform_3, window_bounds = array<i64: 256, 128>}, {pipeline_mode = #tpu.pipeline_mode<synchronous>, transform_indices = @transform_4, window_bounds = array<i64: 1, 128>}, {transform_indices = @transform_5, window_bounds = array<i64: 8, 128>}]} {
    %c0 = arith.constant 0 : index
    %c0_0 = arith.constant 0 : index
    %0 = vector.load %arg2[%c0, %c0_0] : memref<8x1024xbf16, #tpu.memory_space<vmem>>, vector<8x1024xbf16>
    %c0_1 = arith.constant 0 : index
    %c0_2 = arith.constant 0 : index
    %1 = vector.load %arg3[%c0_1, %c0_2] : memref<1024x256xbf16, #tpu.memory_space<vmem>>, vector<1024x256xbf16>
    %cst = arith.constant dense<0.000000e+00> : vector<8x256xf32>
    %2 = tpu.matmul %0, %1, %cst {dimension_numbers = #tpu.dot_dimension_numbers<[1], [0], [0], [1], [0, 0, 1, 1], [], []>} : vector<8x1024xbf16>, vector<1024x256xbf16>, vector<8x256xf32> -> vector<8x256xf32>
    %c0_3 = arith.constant 0 : index
    %c0_4 = arith.constant 0 : index
    %3 = vector.load %arg4[%c0_3, %c0_4] : memref<1x256xf32, #tpu.memory_space<vmem>>, vector<1x256xf32>
    %4 = vector.broadcast %3 : vector<1x256xf32> to vector<8x256xf32>
    %5 = arith.addf %2, %4 : vector<8x256xf32>
    %cst_5 = arith.constant 0.000000e+00 : f32
    %6 = vector.broadcast %cst_5 : f32 to vector<8x256xf32>
    %7 = arith.maximumf %5, %6 : vector<8x256xf32>
    %8 = arith.truncf %7 : vector<8x256xf32> to vector<8x256xbf16>
    %c0_6 = arith.constant 0 : index
    %c0_7 = arith.constant 0 : index
    %9 = vector.load %arg5[%c0_6, %c0_7] : memref<256x128xbf16, #tpu.memory_space<vmem>>, vector<256x128xbf16>
    %cst_8 = arith.constant dense<0.000000e+00> : vector<8x128xf32>
    %10 = tpu.matmul %8, %9, %cst_8 {dimension_numbers = #tpu.dot_dimension_numbers<[1], [0], [0], [1], [0, 0, 1, 1], [], []>} : vector<8x256xbf16>, vector<256x128xbf16>, vector<8x128xf32> -> vector<8x128xf32>
    %c0_9 = arith.constant 0 : index
    %c0_10 = arith.constant 0 : index
    %11 = vector.load %arg6[%c0_9, %c0_10] : memref<1x128xf32, #tpu.memory_space<vmem>>, vector<1x128xf32>
    %12 = vector.broadcast %11 : vector<1x128xf32> to vector<8x128xf32>
    %13 = arith.addf %10, %12 : vector<8x128xf32>
    %14 = arith.truncf %13 : vector<8x128xf32> to vector<8x128xbf16>
    %c0_11 = arith.constant 0 : index
    %c0_12 = arith.constant 0 : index
    %15 = vector.load %arg7[%c0_11, %c0_12] : memref<8x128xbf16, #tpu.memory_space<vmem>>, vector<8x128xbf16>
    tpu.vector_store %arg7[%c0_11, %c0_12], %14 {strides = array<i32>} : memref<8x128xbf16, #tpu.memory_space<vmem>>, vector<8x128xbf16>,
    return
  }
  func.func @transform_0(%arg0: i32, %arg1: memref<1xi32, #tpu.memory_space<smem>>) -> (i32, i32) {
    %c0_i32 = arith.constant 0 : i32
    %c0_i32_0 = arith.constant 0 : i32
    return %arg0, %c0_i32 : i32, i32
  }
  func.func @transform_1(%arg0: i32, %arg1: memref<1xi32, #tpu.memory_space<smem>>) -> (i32, i32) {
    %c0_i32 = arith.constant 0 : i32
    %c0_i32_0 = arith.constant 0 : i32
    %c0_i32_1 = arith.constant 0 : i32
    return %c0_i32, %c0_i32_0 : i32, i32
  }
  func.func @transform_2(%arg0: i32, %arg1: memref<1xi32, #tpu.memory_space<smem>>) -> (i32, i32) {
    %c0_i32 = arith.constant 0 : i32
    %c0_i32_0 = arith.constant 0 : i32
    %c0_i32_1 = arith.constant 0 : i32
    return %c0_i32, %c0_i32_0 : i32, i32
  }
  func.func @transform_3(%arg0: i32, %arg1: memref<1xi32, #tpu.memory_space<smem>>) -> (i32, i32) {
    %c0_i32 = arith.constant 0 : i32
    %c0_i32_0 = arith.constant 0 : i32
    %c0_i32_1 = arith.constant 0 : i32
    return %c0_i32, %c0_i32_0 : i32, i32
  }
  func.func @transform_4(%arg0: i32, %arg1: memref<1xi32, #tpu.memory_space<smem>>) -> (i32, i32) {
    %c0_i32 = arith.constant 0 : i32
    %c0_i32_0 = arith.constant 0 : i32
    %c0_i32_1 = arith.constant 0 : i32
    return %c0_i32, %c0_i32_0 : i32, i32
  }
  func.func @transform_5(%arg0: i32, %arg1: memref<1xi32, #tpu.memory_space<smem>>) -> (i32, i32) {
    %c0_i32 = arith.constant 0 : i32
    %c0_i32_0 = arith.constant 0 : i32
    return %arg0, %c0_i32 : i32, i32
  }
}

</mosaic_0001>

<bundles_post_ra>
// kernel: tpu_custom_call.1
= control target key start
LH: loop header
LB: loop body
LE: loop exit
PB: predicated region body
PF: predicated region fallthrough
CT: control target
= control target key end

     0   :  { %12 = vsyncpa [#allocation5], 0  ;;  %s2396_s0 = inlined_call_operand.<no memory space> [shape: s32[1], index: 0, kind: input, shape index: {}]   ;;  %s2397_s1 = inlined_call_operand.hbm [shape: bf16[16,1024], index: 1, kind: input, shape index: {}]   ;;  %s2398_s2 = inlined_call_operand.hbm [shape: bf16[1024,256], index: 2, kind: input, shape index: {}]   ;;  %s2399_s3 = inlined_call_operand.vmem [shape: f32[1,256], index: 3, kind: input, shape index: {}]   ;;  %s2400_s4 = inlined_call_operand.hbm [shape: bf16[256,128], index: 4, kind: input, shape index: {}]   ;;  %s2401_s5 = inlined_call_operand.vmem [shape: f32[1,128], index: 5, kind: input, shape index: {}]   ;;  %s2402_s6 = inlined_call_operand.hbm [shape: bf16[16,128], index: 6, kind: output, shape index: {}]  }
   0x1   :  { %14 = vsyncpa [#allocation5 + $0x1], 0 }
   0x2   :  { %15 = vsyncpa [#allocation8], 0 }
   0x3   :  { %16 = vsyncpa [#allocation6], 0 }
   0x4   :  { %18 = vsyncpa [#allocation6 + $0x1], 0  ;;  %s2206_s0 = smov 0   ;;  %s2208_s21 = smov 0  }
   0x5   :  { %s2210_s22 = smov 0   ;;  %s2212_s23 = smov 0  }
   0x6 LB: > { %s2227_s24 = sadd.s32 4294967295, %s2161_s23   ;;  %s1533_s25 = sadd.s32 4294967294, %s2161_s23   ;;  %s2161_s23 = sphi %s2212_s23, %s2424_s23   ;;  %s2157_s22 = sphi %s2210_s22, %s2423_s22   ;;  %s2153_s21 = sphi %s2208_s21, %s2422_s21   ;;  %s2149_s0 = sphi %s2206_s0, %s2421_s0  }
   0x7   : > { %p44_p0 = scmp.ne.s32.totalorder %s2153_s21, %s2149_s0  ;;  %p2403_p1 = scmp.eq.s32.totalorder %s2227_s24, 0 }
   0x8   : > { %p158_p3 = scmp.eq.s32.totalorder %s1533_s25, 1  ;;  %p1534_p5 = scmp.ge.s32.totalorder %s2161_s23, 1 }
   0x9   : > { %p2236_p4 = por %p2403_p1, %p44_p0  ;;  %p165_p7 = scmp.lt.s32.totalorder %s2161_s23, 3 }
   0xa   : > { %p2241_p6 = por %p158_p3, %p44_p0  ;;  %s2163_s29 = smov [#allocation7]  }
   0xb   : > { %s2407_s26 = scalar_select %p2236_p4, 1, 0 }
   0xc   : > { %s2408_s27 = scalar_select %p2241_p6, 1, 0 }
   0xd   : > { %p2246_p8 = pnand %p1534_p5, %p165_p7  ;;  %s177_s30 = sshll.u32 %s2163_s29, 4  ;;  %s178_s30 = int_to_ptr.vmem [resolvable:$true] %s177_s30 }
   0xe   : > { %s2164_s8 = smov [#allocation9]   ;;  %s2024_s10 = scalar_lea.vmem %s178_s30, 16384 }
   0xf   : > { %s2409_s28 = scalar_select %p2246_p8, 1, 0 }
  0x10   : > { %p1738_p9 = pneg %p2246_p8  ;;  %s193_s9 = sshll.u32 %s2164_s8, 4  ;;  %s194_s9 = int_to_ptr.vmem [resolvable:$true] %s193_s9 }
  0x11   : > { %p2025_p13 = scmp.ne.s32.totalorder %s178_s30, %s2024_s10  ;;  %p2032_p5 = scmp.lt.s32.totalorder %s178_s30, %s178_s30 }
  0x12   : > { %p2255_p11 = pnand %p1738_p9, %p2403_p1  ;;  %p2033_p7 = scmp.lt.s32.totalorder %s2024_s10, %s2024_s10 }
  0x14   : > { %p2015_p12 = pneg %p2255_p11  ;;  %p2034_p10 = por %p2033_p7, %p2032_p5 }
  0x16   : > { %p2027_p0 = pnand %p2025_p13, %p2015_p12 }
  0x18   : > { %p2028_p3 = pneg %p2027_p0 }
  0x1a   : > { %p2035_p9 = pnand %p2034_p10, %p2028_p3 }
  0x1c   : > { %2038 = shalt.err (!%p2035_p9)
}
  0x1d   : > { %s2165_s11 = smov 128   ;;  %s2166_s12 = smov 8  }
  0x1e   : > { %1741 = dma.hbm_to_vmem [thread:$0]  (!%p2255_p11), %s2398_s2, 16384, %s178_s30, [#allocation8], %s2165_s11, %s2165_s11, %s2166_s12  }
  0x1f   : > { %s2050_s15 = scalar_lea.vmem %s194_s9, 2048  ;;  %p2058_p2 = scmp.lt.s32.totalorder %s194_s9, %s194_s9 }
  0x20   : > { %p2051_p1 = scmp.ne.s32.totalorder %s194_s9, %s2050_s15  ;;  %p2059_p6 = scmp.lt.s32.totalorder %s2050_s15, %s2050_s15 }
  0x22   : > { %p2053_p13 = pnand %p2051_p1, %p2015_p12  ;;  %p2060_p5 = por %p2059_p6, %p2058_p2 }
  0x24   : > { %p2054_p0 = pneg %p2053_p13 }
  0x26   : > { %p2061_p10 = pnand %p2060_p5, %p2054_p0 }
  0x28   : > { %2064 = shalt.err (!%p2061_p10)
}
  0x29   : > { %s2167_s16 = smov 64   ;;  %s2168_s17 = smov 4  }
  0x2a   : > { %1744 = dma.hbm_to_vmem [thread:$0]  (!%p2255_p11), %s2400_s4, 2048, %s194_s9, [#allocation8], %s2167_s16, %s2167_s16, %s2168_s17  }
  0x2b   : > { %s2278_s20 = sadd.s32 1, %s2161_s23   ;;  %s31_s29 = sadd.s32 1, %s2157_s22 }
  0x2c   : > { %s28_s25 = ssub.s32 %s2161_s23, %s2278_s20  ;;  %p38_p2 = scmp.ne.s32.totalorder %s2157_s22, %s2153_s21 }
  0x2d   : > { %p29_p1 = scmp.eq.s32.totalorder %s28_s25, 0  ;;  %p39_p6 = scmp.eq.s32.totalorder %s2161_s23, 0 }
  0x2e   : > { %p2411_p3 = scmp.eq.s32.totalorder %s2227_s24, 1  ;;  %p1755_p9 = scmp.lt.s32.totalorder %s2161_s23, 2 }
  0x2f   : > { %s2287_s30 = scalar_select %p29_p1, %s2157_s22, %s31_s29  }
  0x30   : > { %p40_p12 = por %p39_p6, %p38_p2  ;;  %p2291_p7 = por %p2411_p3, %p38_p2 }
  0x31   : > { %s210_s7 = sand.u32 1, %s2157_s22   ;;  %s1703_s9 = sshll.u32 %s2161_s23, 9 }
  0x32   : > { %s2412_s8 = scalar_select %p2291_p7, 1, 0 }
  0x33   : > { %s1538_s10 = sshll.u32 %s210_s7, 5  ;;  %s2301_s13 = scalar_lea.hbm %s2397_s1, %s1703_s9 }
  0x34   : > { %s214_s14 = scalar_lea.vmem [#allocation4], %s1538_s10  ;;  %p2303_p11 = pnand %p1755_p9, %p40_p12 }
  0x35   : > { %s222_s15 = sshll.u32 %s214_s14, 4  ;;  %s211_s17 = scalar_lea.sflag [#allocation5], %s210_s7  ;;  %s223_s15 = int_to_ptr.vmem [resolvable:$true] %s222_s15 }
  0x36   : > { %s2065_s18 = scalar_lea.hbm %s2301_s13, 512  ;;  %p2067_p0 = pneg %p2303_p11 }
  0x37   : > { %p2066_p13 = scmp.ne.s32.totalorder %s2301_s13, %s2065_s18  ;;  %s2070_s29 = scalar_lea.hbm %s2397_s1, 1024 }
  0x38   : > { %p2071_p1 = scmp.lt.s32.totalorder %s2301_s13, %s2397_s1  ;;  %p2072_p2 = scmp.lt.s32.totalorder %s2070_s29, %s2065_s18 }
  0x39   : > { %p2068_p5 = pnand %p2067_p0, %p2066_p13 }
  0x3a   : > { %p2073_p6 = por %p2072_p2, %p2071_p1 }
  0x3b   : > { %p2069_p10 = pneg %p2068_p5 }
  0x3d   : > { %p2074_p12 = pnand %p2073_p6, %p2069_p10 }
  0x3f   : > { %2077 = shalt.err (!%p2074_p12)
}
  0x40   : > { %s2078_s11 = scalar_lea.vmem %s223_s15, 512  ;;  %s2169_s7 = smov [#allocation4]  }
  0x41   : > { %p2079_p3 = scmp.ne.s32.totalorder %s223_s15, %s2078_s11  ;;  %s2083_s12 = sshll.u32 %s2169_s7, 4  ;;  %s2084_s12 = int_to_ptr.vmem [resolvable:$false] %s2083_s12 }
  0x42   : > { %s2085_s14 = scalar_lea.vmem %s2084_s12, 1024  ;;  %p2086_p13 = scmp.lt.s32.totalorder %s223_s15, %s2084_s12 }
  0x43   : > { %p2081_p9 = pnand %p2079_p3, %p2067_p0  ;;  %p2087_p5 = scmp.lt.s32.totalorder %s2085_s14, %s2078_s11 }
  0x45   : > { %p2082_p7 = pneg %p2081_p9  ;;  %p2088_p4 = por %p2087_p5, %p2086_p13 }
  0x47   : > { %p2089_p8 = pnand %p2088_p4, %p2082_p7 }
  0x49   : > { %2092 = shalt.err (!%p2089_p8)
}
  0x4a   : > { %1748 = dma.hbm_to_vmem [thread:$0]  (!%p2303_p11), %s2301_s13, 512, %s223_s15, %s211_s17  }
  0x4b   : > { %p2414_p10 = scmp.ne.s32.totalorder %s2409_s28, 0 }
  0x4c   : > { %s2324_s18 = sand.u32 (!%p2414_p10), 1, %s2153_s21   ;;  %p2415_p0 = scmp.ne.s32.totalorder (!%p2414_p10), %s2407_s26, 0 }
  0x4d   : > { %231 = sbr.rel (%p2414_p10) target bundleno = 633 (0x279), region = 40  ;;  %s1542_s19 = sshll.u32 (!%p2414_p10), %s2324_s18, 5 }
  0x4e   : > { %s234_s25 = scalar_lea.sflag (!%p2414_p10), [#allocation5], %s2324_s18  ;;  %s2328_s29 = scalar_lea.vmem (!%p2414_p10), [#allocation4], %s1542_s19 }
  0x52   : > { %2136 = dma.done.wait (%p2415_p0), %s234_s25, 512  }
  0x53   : > { %2138 = vsyncadd (%p2415_p0), %s234_s25, 4294966784  ;;  %p2416_p4 = scmp.eq.s32.totalorder %s2227_s24, 0 }
  0x55   : > { %2140 = dma.done.wait (%p2416_p4), [#allocation8], 18432   ;;  %p2417_p8 = pmov %p2416_p4 }
  0x56   : > { %v1797_v0 = vld [vmem:[#allocation7 + $0x74] ss:$8 sps:$4 sm:$0xff]   ;;  %v1801_v2 = vld [vmem:[#allocation7 + $0x70] ss:$8 sps:$4 sm:$0xff]   ;;  %v1803_v4 = vld [vmem:[#allocation7 + $0x64] ss:$8 sps:$4 sm:$0xff]  }
  0x57   : > { %2142 = vsyncadd (%p2417_p8), [#allocation8], 4294948864  ;;  %v1799_v1 = vld [vmem:[#allocation7 + $0x174] ss:$8 sps:$4 sm:$0xff]   ;;  %1085 = vmatprep.subr.bf16.mxu0 %v1797_v0  ;;  %v1802_v3 = vld [vmem:[#allocation7 + $0x170] ss:$8 sps:$4 sm:$0xff]  }
  0x58   : > { %1126 = vmatprep.subr.bf16.mxu1 %v1799_v1  ;;  %1086 = vmatpush1.bf16.msra.mxu0 %v1801_v2  ;;  %v1805_v5 = vld [vmem:[#allocation7 + $0x164] ss:$8 sps:$4 sm:$0xff]   ;;  %v1807_v6 = vld [vmem:[#allocation7 + $0x60] ss:$8 sps:$4 sm:$0xff]   ;;  %v1809_v8 = vld [vmem:[#allocation7 + $0x54] ss:$8 sps:$4 sm:$0xff]  }
  0x59   : > { %1127 = vmatpush1.bf16.msra.mxu1 %v1802_v3  ;;  %1087 = vmatprep.subr.bf16.mxu0 %v1803_v4  ;;  %v1808_v7 = vld [vmem:[#allocation7 + $0x160] ss:$8 sps:$4 sm:$0xff]   ;;  %v1811_v9 = vld [vmem:[#allocation7 + $0x154] ss:$8 sps:$4 sm:$0xff]   ;;  %v1813_v10 = vld [vmem:[#allocation7 + $0x50] ss:$8 sps:$4 sm:$0xff]  }
  0x5a   : > { %1128 = vmatprep.subr.bf16.mxu1 %v1805_v5  ;;  %v1814_v11 = vld [vmem:[#allocation7 + $0x150] ss:$8 sps:$4 sm:$0xff]   ;;  %v1815_v12 = vld [vmem:[#allocation7 + $0x44] ss:$8 sps:$4 sm:$0xff]   ;;  %v1819_v14 = vld [vmem:[#allocation7 + $0x40] ss:$8 sps:$4 sm:$0xff]  }
  0x5b   : > { %v1817_v13 = vld [vmem:[#allocation7 + $0x144] ss:$8 sps:$4 sm:$0xff]   ;;  %v1820_v15 = vld [vmem:[#allocation7 + $0x140] ss:$8 sps:$4 sm:$0xff]   ;;  %v1821_v16 = vld [vmem:[#allocation7 + $0x34] ss:$8 sps:$4 sm:$0xff]  }
  0x5c   : > { %1088 = vmatpush1.bf16.msra.mxu0 %v1807_v6  ;;  %v1823_v17 = vld [vmem:[#allocation7 + $0x134] ss:$8 sps:$4 sm:$0xff]   ;;  %v1825_v18 = vld [vmem:[#allocation7 + $0x30] ss:$8 sps:$4 sm:$0xff]   ;;  %v1827_v20 = vld [vmem:[#allocation7 + $0x24] ss:$8 sps:$4 sm:$0xff]  }
  0x5d   : > { %1129 = vmatpush1.bf16.msra.mxu1 %v1808_v7  ;;  %1089 = vmatprep.subr.bf16.mxu0 %v1809_v8  ;;  %v1826_v19 = vld [vmem:[#allocation7 + $0x130] ss:$8 sps:$4 sm:$0xff]   ;;  %v1829_v21 = vld [vmem:[#allocation7 + $0x124] ss:$8 sps:$4 sm:$0xff]   ;;  %v1831_v22 = vld [vmem:[#allocation7 + $0x20] ss:$8 sps:$4 sm:$0xff]  }
  0x5e   : > { %1130 = vmatprep.subr.bf16.mxu1 %v1811_v9  ;;  %v1832_v23 = vld [vmem:[#allocation7 + $0x120] ss:$8 sps:$4 sm:$0xff]   ;;  %v1833_v24 = vld [vmem:[#allocation7 + $0x14] ss:$8 sps:$4 sm:$0xff]   ;;  %v1837_v26 = vld [vmem:[#allocation7 + $0x10] ss:$8 sps:$4 sm:$0xff]  }
  0x5f   : > { %v1835_v25 = vld [vmem:[#allocation7 + $0x114] ss:$8 sps:$4 sm:$0xff]   ;;  %v1838_v27 = vld [vmem:[#allocation7 + $0x110] ss:$8 sps:$4 sm:$0xff]   ;;  %v1839_v28 = vld [vmem:[#allocation7 + $0x4] ss:$8 sps:$4 sm:$0xff]  }
  0x60   : > { %1090 = vmatpush1.bf16.msra.mxu0 %v1813_v10  ;;  %v1841_v29 = vld [vmem:[#allocation7 + $0x104] ss:$8 sps:$4 sm:$0xff]   ;;  %v1843_v30 = vld [vmem:[#allocation7] ss:$8 sps:$4 sm:$0xff]   ;;  %v1845_v32 = vld [vmem:[#allocation7 + $0xf4] ss:$8 sps:$4 sm:$0xff]  }
  0x61   : > { %1131 = vmatpush1.bf16.msra.mxu1 %v1814_v11  ;;  %1091 = vmatprep.subr.bf16.mxu0 %v1815_v12  ;;  %v1844_v31 = vld [vmem:[#allocation7 + $0x100] ss:$8 sps:$4 sm:$0xff]   ;;  %v1847_v33 = vld [vmem:[#allocation7 + $0x1f4] ss:$8 sps:$4 sm:$0xff]   ;;  %v1849_v34 = vld [vmem:[#allocation7 + $0xf0] ss:$8 sps:$4 sm:$0xff]  }
  0x62   : > { %1132 = vmatprep.subr.bf16.mxu1 %v1817_v13  ;;  %v1850_v35 = vld [vmem:[#allocation7 + $0x1f0] ss:$8 sps:$4 sm:$0xff]   ;;  %v1851_v36 = vld [vmem:[#allocation7 + $0xe4] ss:$8 sps:$4 sm:$0xff]   ;;  %v1855_v38 = vld [vmem:[#allocation7 + $0xe0] ss:$8 sps:$4 sm:$0xff]  }
  0x63   : > { %v1853_v37 = vld [vmem:[#allocation7 + $0x1e4] ss:$8 sps:$4 sm:$0xff]   ;;  %v1856_v39 = vld [vmem:[#allocation7 + $0x1e0] ss:$8 sps:$4 sm:$0xff]   ;;  %v1857_v40 = vld [vmem:[#allocation7 + $0xd4] ss:$8 sps:$4 sm:$0xff]  }
  0x64   : > { %1092 = vmatpush1.bf16.msra.mxu0 %v1819_v14  ;;  %v1859_v41 = vld [vmem:[#allocation7 + $0x1d4] ss:$8 sps:$4 sm:$0xff]   ;;  %v1861_v42 = vld [vmem:[#allocation7 + $0xd0] ss:$8 sps:$4 sm:$0xff]   ;;  %v1863_v44 = vld [vmem:[#allocation7 + $0xc4] ss:$8 sps:$4 sm:$0xff]  }
  0x65   : > { %1133 = vmatpush1.bf16.msra.mxu1 %v1820_v15  ;;  %1093 = vmatprep.subr.bf16.mxu0 %v1821_v16  ;;  %v1862_v43 = vld [vmem:[#allocation7 + $0x1d0] ss:$8 sps:$4 sm:$0xff]   ;;  %v1865_v45 = vld [vmem:[#allocation7 + $0x1c4] ss:$8 sps:$4 sm:$0xff]   ;;  %v1867_v49 = vld [vmem:[#allocation7 + $0xc0] ss:$8 sps:$4 sm:$0xff]  }
  0x66   : > { %1134 = vmatprep.subr.bf16.mxu1 %v1823_v17  ;;  %v273_v46 = vld [vmem:[%s2328_s29] sm:$0xff]  ;;  %v274_v48 = vld [vmem:[%s2328_s29 + $0x8] sm:$0xff]  ;;  %v1869_v52 = vld [vmem:[#allocation7 + $0xb4] ss:$8 sps:$4 sm:$0xff]   ;;  %s1545_s13 = sshll.u32 %s2324_s18, 2  ;;  %s1700_s17 = sshll.u32 %s2227_s24, 6 }
  0x67   : > { %v1547_v47 = vcombine.high %v273_v46, %v273_v46  ;;  %v1868_v50 = vld [vmem:[#allocation7 + $0x1c0] ss:$8 sps:$4 sm:$0xff]   ;;  %v1549_v51 = vcombine.high %v274_v48, %v274_v48  ;;  %v1871_v53 = vld [vmem:[#allocation7 + $0x1b4] ss:$8 sps:$4 sm:$0xff]   ;;  %v1873_v54 = vld [vmem:[#allocation7 + $0xb0] ss:$8 sps:$4 sm:$0xff]   ;;  %v1546_v6 = vcombine.low %v273_v46, %v273_v46  ;;  %v1548_v7 = vcombine.low %v274_v48, %v274_v48  ;;  %s1442_s12 = scalar_lea.hbm %s2402_s6, %s1700_s17 }
  0x68   : > { %1094 = vmatpush1.bf16.msra.mxu0 %v1825_v18  ;;  %v1874_v55 = vld [vmem:[#allocation7 + $0x1b0] ss:$8 sps:$4 sm:$0xff]   ;;  %v1875_v56 = vld [vmem:[#allocation7 + $0xa4] ss:$8 sps:$4 sm:$0xff]   ;;  %v1879_v58 = vld [vmem:[#allocation7 + $0xa0] ss:$8 sps:$4 sm:$0xff]  }
  0x69   : > { %1135 = vmatpush1.bf16.msra.mxu1 %v1826_v19  ;;  %1095 = vmatprep.subr.bf16.mxu0 %v1827_v20  ;;  %v1877_v57 = vld [vmem:[#allocation7 + $0x1a4] ss:$8 sps:$4 sm:$0xff]   ;;  %v1880_v59 = vld [vmem:[#allocation7 + $0x1a0] ss:$8 sps:$4 sm:$0xff]   ;;  %v1881_v60 = vld [vmem:[#allocation7 + $0x94] ss:$8 sps:$4 sm:$0xff]  }
  0x6a   : > { %1136 = vmatprep.subr.bf16.mxu1 %v1829_v21  ;;  %1117 = vmatprep.mubr.bf16.mxu0 %v1547_v47  ;;  %v1883_v61 = vld [vmem:[#allocation7 + $0x194] ss:$8 sps:$4 sm:$0xff]   ;;  %v1885_v62 = vld [vmem:[#allocation7 + $0x90] ss:$8 sps:$4 sm:$0xff]   ;;  %v1887_v0 = vld [vmem:[#allocation7 + $0x84] ss:$8 sps:$4 sm:$0xff]  }
  0x6b   : > { %1158 = vmatprep.mubr.bf16.mxu1 %v1549_v51  ;;  %v1886_v63 = vld [vmem:[#allocation7 + $0x190] ss:$8 sps:$4 sm:$0xff]   ;;  %v1889_v1 = vld [vmem:[#allocation7 + $0x184] ss:$8 sps:$4 sm:$0xff]   ;;  %v1891_v2 = vld [vmem:[#allocation7 + $0x80] ss:$8 sps:$4 sm:$0xff]  }
  0x6c   : > { %1096 = vmatpush1.bf16.msra.mxu0 %v1831_v22  ;;  %v1892_v3 = vld [vmem:[#allocation7 + $0x180] ss:$8 sps:$4 sm:$0xff]   ;;  %v1899_v4 = vld [vmem:[#allocation7 + $0x274] ss:$8 sps:$4 sm:$0xff]   ;;  %v1897_v8 = vld [vmem:[#allocation7 + $0x270] ss:$8 sps:$4 sm:$0xff]  }
  0x6d   : > { %1137 = vmatpush1.bf16.msra.mxu1 %v1832_v23  ;;  %1097 = vmatprep.subr.bf16.mxu0 %v1833_v24  ;;  %v1902_v5 = vld [vmem:[#allocation7 + $0x374] ss:$8 sps:$4 sm:$0xff]   ;;  %v1900_v9 = vld [vmem:[#allocation7 + $0x370] ss:$8 sps:$4 sm:$0xff]   ;;  %v1905_v10 = vld [vmem:[#allocation7 + $0x264] ss:$8 sps:$4 sm:$0xff]  }
  0x6e   : > { %1138 = vmatprep.subr.bf16.mxu1 %v1835_v25  ;;  %v1908_v11 = vld [vmem:[#allocation7 + $0x364] ss:$8 sps:$4 sm:$0xff]   ;;  %v1903_v12 = vld [vmem:[#allocation7 + $0x260] ss:$8 sps:$4 sm:$0xff]   ;;  %v1911_v14 = vld [vmem:[#allocation7 + $0x254] ss:$8 sps:$4 sm:$0xff]  }
  0x6f   : > { %v1906_v13 = vld [vmem:[#allocation7 + $0x360] ss:$8 sps:$4 sm:$0xff]   ;;  %v1914_v15 = vld [vmem:[#allocation7 + $0x354] ss:$8 sps:$4 sm:$0xff]   ;;  %v1909_v16 = vld [vmem:[#allocation7 + $0x250] ss:$8 sps:$4 sm:$0xff]  }
  0x70   : > { %1098 = vmatpush1.bf16.msra.mxu0 %v1837_v26  ;;  %v1912_v17 = vld [vmem:[#allocation7 + $0x350] ss:$8 sps:$4 sm:$0xff]   ;;  %v1917_v18 = vld [vmem:[#allocation7 + $0x244] ss:$8 sps:$4 sm:$0xff]   ;;  %v1915_v20 = vld [vmem:[#allocation7 + $0x240] ss:$8 sps:$4 sm:$0xff]  }
  0x71   : > { %1139 = vmatpush1.bf16.msra.mxu1 %v1838_v27  ;;  %1099 = vmatprep.subr.bf16.mxu0 %v1839_v28  ;;  %v1920_v19 = vld [vmem:[#allocation7 + $0x344] ss:$8 sps:$4 sm:$0xff]   ;;  %v1918_v21 = vld [vmem:[#allocation7 + $0x340] ss:$8 sps:$4 sm:$0xff]   ;;  %v1923_v22 = vld [vmem:[#allocation7 + $0x234] ss:$8 sps:$4 sm:$0xff]  }
  0x72   : > { %1140 = vmatprep.subr.bf16.mxu1 %v1841_v29  ;;  %v1926_v23 = vld [vmem:[#allocation7 + $0x334] ss:$8 sps:$4 sm:$0xff]   ;;  %v1921_v24 = vld [vmem:[#allocation7 + $0x230] ss:$8 sps:$4 sm:$0xff]   ;;  %v1929_v26 = vld [vmem:[#allocation7 + $0x224] ss:$8 sps:$4 sm:$0xff]  }
  0x73   : > { %v1924_v25 = vld [vmem:[#allocation7 + $0x330] ss:$8 sps:$4 sm:$0xff]   ;;  %v1932_v27 = vld [vmem:[#allocation7 + $0x324] ss:$8 sps:$4 sm:$0xff]   ;;  %v1927_v28 = vld [vmem:[#allocation7 + $0x220] ss:$8 sps:$4 sm:$0xff]  }
  0x74   : > { %1100 = vmatpush1.bf16.msra.mxu0 %v1843_v30  ;;  %v1930_v29 = vld [vmem:[#allocation7 + $0x320] ss:$8 sps:$4 sm:$0xff]   ;;  %v1935_v30 = vld [vmem:[#allocation7 + $0x214] ss:$8 sps:$4 sm:$0xff]   ;;  %v1953_v46 = vld [vmem:[#allocation7 + $0x2e4] ss:$8 sps:$4 sm:$0xff]  }
  0x75   : > { %1141 = vmatpush1.bf16.msra.mxu1 %v1844_v31  ;;  %1101 = vmatprep.subr.bf16.mxu0 %v1845_v32  ;;  %v1938_v31 = vld [vmem:[#allocation7 + $0x314] ss:$8 sps:$4 sm:$0xff]   ;;  %v1933_v32 = vld [vmem:[#allocation7 + $0x210] ss:$8 sps:$4 sm:$0xff]   ;;  %v1956_v47 = vld [vmem:[#allocation7 + $0x3e4] ss:$8 sps:$4 sm:$0xff]  }
  0x76   : > { %1142 = vmatprep.subr.bf16.mxu1 %v1847_v33  ;;  %v1936_v33 = vld [vmem:[#allocation7 + $0x310] ss:$8 sps:$4 sm:$0xff]   ;;  %v1951_v48 = vld [vmem:[#allocation7 + $0x2e0] ss:$8 sps:$4 sm:$0xff]   ;;  %v1962_v51 = vld [vmem:[#allocation7 + $0x3d4] ss:$8 sps:$4 sm:$0xff]  }
  0x77   : > { %s271_s9 = scalar_lea.vmem [#allocation10], %s1545_s13  ;;  %s1431_s14 = scalar_lea.sflag [#allocation6], %s2324_s18 }
  0x78   : > { %1102 = vmatpush2.bf16.msra.mxu0 %v1849_v34  ;;  %v2341_v34 = vld [vmem:[%s2328_s29 + $0x10] sm:$0xff]  ;;  %s1444_s10 = sshll.u32 %s271_s9, 4  ;;  %p2418_p11 = scmp.ne.s32.totalorder %s2412_s8, 0  ;;  %s1445_s10 = int_to_ptr.vmem [resolvable:$true] %s1444_s10 }
  0x79   : > { %1143 = vmatpush2.bf16.msra.mxu1 %v1850_v35  ;;  %1103 = vmatprep.subr.bf16.mxu0 %v1851_v36  ;;  %v2344_v35 = vld [vmem:[%s2328_s29 + $0x18] sm:$0xff]  ;;  %v1941_v36 = vld [vmem:[#allocation7 + $0x204] ss:$8 sps:$4 sm:$0xff]   ;;  %s2093_s19 = scalar_lea.vmem %s1445_s10, 64  ;;  %s2170_s25 = smov [#allocation10]  }
  0x7a   : > { %1144 = vmatprep.subr.bf16.mxu1 %v1853_v37  ;;  %v1944_v37 = vld [vmem:[#allocation7 + $0x304] ss:$8 sps:$4 sm:$0xff]   ;;  %p2094_p7 = scmp.ne.s32.totalorder %s1445_s10, %s2093_s19  ;;  %s2097_s29 = sshll.u32 %s2170_s25, 4  ;;  %s2098_s29 = int_to_ptr.vmem [resolvable:$false] %s2097_s29 }
  0x7b   : > { %s2099_s24 = scalar_lea.vmem %s2098_s29, 128  ;;  %p2100_p6 = scmp.lt.s32.totalorder %s1445_s10, %s2098_s29 }
  0x7c   : > { %1104 = vmatpush2.bf16.msra.mxu0 %v1855_v38  ;;  %v1551_v38 = vcombine.high %v2341_v34, %v2341_v34  ;;  %p2095_p1 = pnand %p2094_p7, %p2418_p11  ;;  %p2101_p12 = scmp.lt.s32.totalorder %s2099_s24, %s2093_s19 }
  0x7d   : > { %1145 = vmatpush2.bf16.msra.mxu1 %v1856_v39  ;;  %1105 = vmatprep.subr.bf16.mxu0 %v1857_v40  ;;  %v1553_v39 = vcombine.high %v2344_v35, %v2344_v35  ;;  %v1939_v40 = vld [vmem:[#allocation7 + $0x200] ss:$8 sps:$4 sm:$0xff]  }
  0x7e   : > { %1146 = vmatprep.subr.bf16.mxu1 %v1859_v41  ;;  %v1942_v41 = vld [vmem:[#allocation7 + $0x300] ss:$8 sps:$4 sm:$0xff]   ;;  %p2096_p2 = pneg %p2095_p1  ;;  %p2102_p3 = por %p2101_p12, %p2100_p6 }
  0x80   : > { %1106 = vmatpush2.bf16.msra.mxu0 %v1861_v42  ;;  %v1947_v42 = vld [vmem:[#allocation7 + $0x2f4] ss:$8 sps:$4 sm:$0xff]   ;;  %p2103_p9 = pnand %p2102_p3, %p2096_p2 }
  0x81   : > { %1147 = vmatpush2.bf16.msra.mxu1 %v1862_v43  ;;  %1107 = vmatprep.subr.bf16.mxu0 %v1863_v44  ;;  %v1950_v43 = vld [vmem:[#allocation7 + $0x3f4] ss:$8 sps:$4 sm:$0xff]   ;;  %v1945_v44 = vld [vmem:[#allocation7 + $0x2f0] ss:$8 sps:$4 sm:$0xff]  }
  0x82   : > { %1148 = vmatprep.subr.bf16.mxu1 %v1865_v45  ;;  %v1948_v45 = vld [vmem:[#allocation7 + $0x3f0] ss:$8 sps:$4 sm:$0xff]  }
  0x84   : > { %1108 = vmatpush2.bf16.msra.mxu0 %v1867_v49  ;;  %v1954_v49 = vld [vmem:[#allocation7 + $0x3e0] ss:$8 sps:$4 sm:$0xff]  }
  0x85   : > { %1149 = vmatpush2.bf16.msra.mxu1 %v1868_v50  ;;  %1109 = vmatprep.subr.bf16.mxu0 %v1869_v52  ;;  %v1959_v50 = vld [vmem:[#allocation7 + $0x2d4] ss:$8 sps:$4 sm:$0xff]   ;;  %v1957_v52 = vld [vmem:[#allocation7 + $0x2d0] ss:$8 sps:$4 sm:$0xff]  }
  0x86   : > { %1150 = vmatprep.subr.bf16.mxu1 %v1871_v53  ;;  %v1960_v53 = vld [vmem:[#allocation7 + $0x3d0] ss:$8 sps:$4 sm:$0xff]  }
  0x88   : > { %1110 = vmatpush2.bf16.msra.mxu0 %v1873_v54  ;;  %v1965_v54 = vld [vmem:[#allocation7 + $0x2c4] ss:$8 sps:$4 sm:$0xff]  }
  0x89   : > { %1151 = vmatpush2.bf16.msra.mxu1 %v1874_v55  ;;  %1111 = vmatprep.subr.bf16.mxu0 %v1875_v56  ;;  %v1968_v55 = vld [vmem:[#allocation7 + $0x3c4] ss:$8 sps:$4 sm:$0xff]   ;;  %v1963_v56 = vld [vmem:[#allocation7 + $0x2c0] ss:$8 sps:$4 sm:$0xff]  }
  0x8a   : > { %1152 = vmatprep.subr.bf16.mxu1 %v1877_v57  ;;  %v1966_v57 = vld [vmem:[#allocation7 + $0x3c0] ss:$8 sps:$4 sm:$0xff]  }
  0x8c   : > { %1112 = vmatpush2.bf16.msra.mxu0 %v1879_v58  ;;  %v1971_v58 = vld [vmem:[#allocation7 + $0x2b4] ss:$8 sps:$4 sm:$0xff]  }
  0x8d   : > { %1153 = vmatpush2.bf16.msra.mxu1 %v1880_v59  ;;  %1113 = vmatprep.subr.bf16.mxu0 %v1881_v60  ;;  %v1974_v59 = vld [vmem:[#allocation7 + $0x3b4] ss:$8 sps:$4 sm:$0xff]   ;;  %v1969_v60 = vld [vmem:[#allocation7 + $0x2b0] ss:$8 sps:$4 sm:$0xff]  }
  0x8e   : > { %1154 = vmatprep.subr.bf16.mxu1 %v1883_v61  ;;  %v1972_v61 = vld [vmem:[#allocation7 + $0x3b0] ss:$8 sps:$4 sm:$0xff]  }
  0x90   : > { %1114 = vmatpush2.bf16.msra.mxu0 %v1885_v62  ;;  %v1977_v62 = vld [vmem:[#allocation7 + $0x2a4] ss:$8 sps:$4 sm:$0xff]  }
  0x91   : > { %1155 = vmatpush2.bf16.msra.mxu1 %v1886_v63  ;;  %1115 = vmatprep.subr.bf16.mxu0 %v1887_v0  ;;  %v1980_v63 = vld [vmem:[#allocation7 + $0x3a4] ss:$8 sps:$4 sm:$0xff]   ;;  %v1975_v0 = vld [vmem:[#allocation7 + $0x2a0] ss:$8 sps:$4 sm:$0xff]  }
  0x92   : > { %1156 = vmatprep.subr.bf16.mxu1 %v1889_v1  ;;  %v1978_v1 = vld [vmem:[#allocation7 + $0x3a0] ss:$8 sps:$4 sm:$0xff]  }
  0x94   : > { %1116 = vmatpush2.bf16.msra.mxu0 %v1891_v2  ;;  %v1983_v2 = vld [vmem:[#allocation7 + $0x294] ss:$8 sps:$4 sm:$0xff]  }
  0x95   : > { %1157 = vmatpush2.bf16.msra.mxu1 %v1892_v3  ;;  %1167 = vmatprep.subr.bf16.mxu0 %v1899_v4  ;;  %v1986_v3 = vld [vmem:[#allocation7 + $0x394] ss:$8 sps:$4 sm:$0xff]   ;;  %v1981_v4 = vld [vmem:[#allocation7 + $0x290] ss:$8 sps:$4 sm:$0xff]  }
  0x96   : > { %1208 = vmatprep.subr.bf16.mxu1 %v1902_v5  ;;  %v1984_v5 = vld [vmem:[#allocation7 + $0x390] ss:$8 sps:$4 sm:$0xff]  }
  0x97   : > { %1118 = vmatmul.mubr.bf16.vlgmr.msra.gmra.mxu0 %v1546_v6  ;;  %v1989_v6 = vld [vmem:[#allocation7 + $0x284] ss:$8 sps:$4 sm:$0xff]  }
  0x98   : > { %1159 = vmatmul.mubr.bf16.vlgmr.msra.gmra.mxu1 %v1548_v7  ;;  %1168 = vmatpush1.bf16.msra.mxu0 %v1897_v8  ;;  %v1992_v7 = vld [vmem:[#allocation7 + $0x384] ss:$8 sps:$4 sm:$0xff]   ;;  %v1987_v8 = vld [vmem:[#allocation7 + $0x280] ss:$8 sps:$4 sm:$0xff]  }
  0x99   : > { %1209 = vmatpush1.bf16.msra.mxu1 %v1900_v9  ;;  %1169 = vmatprep.subr.bf16.mxu0 %v1905_v10  ;;  %v1990_v9 = vld [vmem:[#allocation7 + $0x380] ss:$8 sps:$4 sm:$0xff]   ;;  %v1550_v10 = vcombine.low %v2341_v34, %v2341_v34 }
  0x9a   : > { %1210 = vmatprep.subr.bf16.mxu1 %v1908_v11  ;;  %1199 = vmatprep.mubr.bf16.mxu0 %v1551_v38  ;;  %v1552_v11 = vcombine.low %v2344_v35, %v2344_v35 }
  0x9b   : > { %1240 = vmatprep.mubr.bf16.mxu1 %v1553_v39  ;;  %v405_v39 = vld [vmem:[%s2399_s3] sm:$0x3] }
  0x9c   : > { %1170 = vmatpush1.bf16.msra.mxu0 %v1903_v12  ;;  %v1997_v12 = vld [vmem:[#allocation9 + $0x78] sm:$0xff]  }
  0x9d   : > { %1211 = vmatpush1.bf16.msra.mxu1 %v1906_v13  ;;  %1171 = vmatprep.subr.bf16.mxu0 %v1911_v14  ;;  %v1998_v13 = vld [vmem:[#allocation9 + $0x38] sm:$0xff]   ;;  %v1999_v14 = vld [vmem:[#allocation9 + $0x70] sm:$0xff]  }
  0x9e   : > { %1212 = vmatprep.subr.bf16.mxu1 %v1914_v15  ;;  %v2000_v15 = vld [vmem:[#allocation9 + $0x30] sm:$0xff]  }
  0xa0   : > { %1172 = vmatpush1.bf16.msra.mxu0 %v1909_v16  ;;  %v2001_v16 = vld [vmem:[#allocation9 + $0x68] sm:$0xff]  }
  0xa1   : > { %1213 = vmatpush1.bf16.msra.mxu1 %v1912_v17  ;;  %1173 = vmatprep.subr.bf16.mxu0 %v1917_v18  ;;  %v2002_v17 = vld [vmem:[#allocation9 + $0x28] sm:$0xff]   ;;  %v2003_v18 = vld [vmem:[#allocation9 + $0x60] sm:$0xff]  }
  0xa2   : > { %1214 = vmatprep.subr.bf16.mxu1 %v1920_v19  ;;  %v2004_v19 = vld [vmem:[#allocation9 + $0x20] sm:$0xff]  }
  0xa4   : > { %1174 = vmatpush1.bf16.msra.mxu0 %v1915_v20  ;;  %v2005_v20 = vld [vmem:[#allocation9 + $0x58] sm:$0xff]  }
  0xa5   : > { %1215 = vmatpush1.bf16.msra.mxu1 %v1918_v21  ;;  %1175 = vmatprep.subr.bf16.mxu0 %v1923_v22  ;;  %v2006_v21 = vld [vmem:[#allocation9 + $0x18] sm:$0xff]   ;;  %v2007_v22 = vld [vmem:[#allocation9 + $0x50] sm:$0xff]  }
  0xa6   : > { %1216 = vmatprep.subr.bf16.mxu1 %v1926_v23  ;;  %v2008_v23 = vld [vmem:[#allocation9 + $0x10] sm:$0xff]  }
  0xa8   : > { %1176 = vmatpush1.bf16.msra.mxu0 %v1921_v24  ;;  %v2009_v24 = vld [vmem:[#allocation9 + $0x48] sm:$0xff]  }
  0xa9   : > { %1217 = vmatpush1.bf16.msra.mxu1 %v1924_v25  ;;  %1177 = vmatprep.subr.bf16.mxu0 %v1929_v26  ;;  %v2010_v25 = vld [vmem:[#allocation9 + $0x8] sm:$0xff]   ;;  %v2011_v26 = vld [vmem:[#allocation9 + $0x40] sm:$0xff]  }
  0xaa   : > { %1218 = vmatprep.subr.bf16.mxu1 %v1932_v27  ;;  %v2012_v27 = vld [vmem:[#allocation9] sm:$0xff]  }
  0xac   : > { %1178 = vmatpush1.bf16.msra.mxu0 %v1927_v28 }
  0xad   : > { %1219 = vmatpush1.bf16.msra.mxu1 %v1930_v29  ;;  %1179 = vmatprep.subr.bf16.mxu0 %v1935_v30 }
  0xae   : > { %1220 = vmatprep.subr.bf16.mxu1 %v1938_v31 }
  0xb0   : > { %1180 = vmatpush1.bf16.msra.mxu0 %v1933_v32 }
  0xb1   : > { %1221 = vmatpush1.bf16.msra.mxu1 %v1936_v33  ;;  %1181 = vmatprep.subr.bf16.mxu0 %v1941_v36  ;;  %v407_v36 = vlaneseq }
  0xb2   : > { %1222 = vmatprep.subr.bf16.mxu1 %v1944_v37 }
  0xb3   : > { %v408_v37 = vshrl.u32 %v407_v36, 7 }
  0xb4   : > { %1182 = vmatpush1.bf16.msra.mxu0 %v1939_v40 }
  0xb5   : > { %1223 = vmatpush1.bf16.msra.mxu1 %v1942_v41  ;;  %1183 = vmatprep.subr.bf16.mxu0 %v1947_v42  ;;  %v409_v38 = vsub.s32 0, %v408_v37  ;;  %v413_v40 = vsub.s32 1, %v408_v37 }
  0xb6   : > { %1224 = vmatprep.subr.bf16.mxu1 %v1950_v43 }
  0xb7   : > { %v410_v41 = vrot.slane %v405_v39, %v409_v38  ;;  %v414_v42 = vrot.slane %v405_v39, %v413_v40 }
  0xb8   : > { %1184 = vmatpush2.bf16.msra.mxu0 %v1945_v44 }
  0xb9   : > { %1225 = vmatpush2.bf16.msra.mxu1 %v1948_v45  ;;  %1185 = vmatprep.subr.bf16.mxu0 %v1953_v46 }
  0xba   : > { %1226 = vmatprep.subr.bf16.mxu1 %v1956_v47 }
  0xbc   : > { %1186 = vmatpush2.bf16.msra.mxu0 %v1951_v48 }
  0xbd   : > { %1227 = vmatpush2.bf16.msra.mxu1 %v1954_v49  ;;  %1187 = vmatprep.subr.bf16.mxu0 %v1959_v50 }
  0xbe   : > { %1228 = vmatprep.subr.bf16.mxu1 %v1962_v51 }
  0xc0   : > { %1188 = vmatpush2.bf16.msra.mxu0 %v1957_v52 }
  0xc1   : > { %1229 = vmatpush2.bf16.msra.mxu1 %v1960_v53  ;;  %1189 = vmatprep.subr.bf16.mxu0 %v1965_v54 }
  0xc2   : > { %1230 = vmatprep.subr.bf16.mxu1 %v1968_v55 }
  0xc4   : > { %1190 = vmatpush2.bf16.msra.mxu0 %v1963_v56 }
  0xc5   : > { %1231 = vmatpush2.bf16.msra.mxu1 %v1966_v57  ;;  %1191 = vmatprep.subr.bf16.mxu0 %v1971_v58 }
  0xc6   : > { %1232 = vmatprep.subr.bf16.mxu1 %v1974_v59 }
  0xc8   : > { %1192 = vmatpush2.bf16.msra.mxu0 %v1969_v60 }
  0xc9   : > { %1233 = vmatpush2.bf16.msra.mxu1 %v1972_v61  ;;  %1193 = vmatprep.subr.bf16.mxu0 %v1977_v62 }
  0xca   : > { %1234 = vmatprep.subr.bf16.mxu1 %v1980_v63 }
  0xcc   : > { %1194 = vmatpush2.bf16.msra.mxu0 %v1975_v0  ;;  %v1682_v0 = vld [vmem:[%s2401_s5] ss:$0 sm:$0xff] }
  0xcd   : > { %1235 = vmatpush2.bf16.msra.mxu1 %v1978_v1  ;;  %1195 = vmatprep.subr.bf16.mxu0 %v1983_v2 }
  0xce   : > { %1236 = vmatprep.subr.bf16.mxu1 %v1986_v3 }
  0xd0   : > { %1196 = vmatpush2.bf16.msra.mxu0 %v1981_v4 }
  0xd1   : > { %1237 = vmatpush2.bf16.msra.mxu1 %v1984_v5  ;;  %1197 = vmatprep.subr.bf16.mxu0 %v1989_v6 }
  0xd2   : > { %1238 = vmatprep.subr.bf16.mxu1 %v1992_v7 }
  0xd4   : > { %1198 = vmatpush2.bf16.msra.mxu0 %v1987_v8 }
  0xd5   : > { %1239 = vmatpush2.bf16.msra.mxu1 %v1990_v9  ;;  %1704 = vmatprep.subr.bf16.mxu0 %v1997_v12 }
  0xd7   : > { %1200 = vmatmul.mubr.bf16.vlgmr.msra.gmra.mxu0 %v1550_v10 }
  0xd8   : > { %1241 = vmatmul.mubr.bf16.vlgmr.msra.gmra.mxu1 %v1552_v11  ;;  %1705 = vmatpush3.bf16.msra.mxu0 %v1998_v13 }
  0xd9   : > { %1706 = vmatprep.subr.bf16.mxu0 %v1999_v14 }
  0xdc   : > { %1707 = vmatpush3.bf16.msra.mxu0 %v2000_v15 }
  0xdd   : > { %1708 = vmatprep.subr.bf16.mxu0 %v2001_v16 }
  0xe0   : > { %1709 = vmatpush3.bf16.msra.mxu0 %v2002_v17 }
  0xe1   : > { %1710 = vmatprep.subr.bf16.mxu0 %v2003_v18 }
  0xe4   : > { %1711 = vmatpush3.bf16.msra.mxu0 %v2004_v19 }
  0xe5   : > { %1712 = vmatprep.subr.bf16.mxu0 %v2005_v20 }
  0xe8   : > { %1713 = vmatpush3.bf16.msra.mxu0 %v2006_v21 }
  0xe9   : > { %1714 = vmatprep.subr.bf16.mxu0 %v2007_v22 }
  0xec   : > { %1715 = vmatpush3.bf16.msra.mxu0 %v2008_v23 }
  0xed   : > { %1716 = vmatprep.subr.bf16.mxu0 %v2009_v24 }
  0xf0   : > { %1717 = vmatpush3.bf16.msra.mxu0 %v2010_v25 }
  0xf1   : > { %1718 = vmatprep.subr.bf16.mxu0 %v2011_v26 }
  0xf4   : > { %1719 = vmatpush3.bf16.msra.mxu0 %v2012_v27 }
 0x157   : > { %v1119_v28 = vpop.f32.mrf.mxu0 }
 0x158   : > { %v1160_v29 = vpop.f32.mrf.mxu1  ;;  %v1120_v43 = vadd.f32 %v1119_v28, %v410_v41 }
 0x159   : > { %v1121_v30 = vpop.f32.mrf.mxu0 }
 0x15a   : > { %v1162_v31 = vpop.f32.mrf.mxu1  ;;  %v1122_v44 = vadd.f32 %v1121_v30, %v414_v42  ;;  %v1161_v45 = vadd.f32 %v1160_v29, %v1120_v43 }
 0x15b   : > { %v1123_v32 = vpop.f32.mrf.mxu0 }
 0x15c   : > { %v1164_v33 = vpop.f32.mrf.mxu1  ;;  %v1163_v48 = vadd.f32 %v1162_v31, %v1122_v44 }
 0x15d   : > { %v1124_v34 = vpop.f32.mrf.mxu0 }
 0x15e   : > { %v1165_v35 = vpop.f32.mrf.mxu1 }
 0x197   : > { %v1201_v46 = vpop.f32.mrf.mxu0 }
 0x198   : > { %v1242_v47 = vpop.f32.mrf.mxu1  ;;  %v1202_v49 = vadd.f32 %v1201_v46, %v1161_v45 }
 0x199   : > { %v1203_v50 = vpop.f32.mrf.mxu0 }
 0x19a   : > { %v1244_v51 = vpop.f32.mrf.mxu1  ;;  %v1243_v52 = vadd.f32 %v1242_v47, %v1202_v49  ;;  %v1204_v53 = vadd.f32 %v1203_v50, %v1163_v48 }
 0x19b   : > { %v1205_v54 = vpop.f32.mrf.mxu0 }
 0x19c   : > { %v1246_v55 = vpop.f32.mrf.mxu1  ;;  %v1245_v56 = vadd.f32 %v1244_v51, %v1204_v53  ;;  %v1249_v57 = vmax.f32 %v1243_v52, 0.0 }
 0x19d   : > { %v1206_v58 = vpop.f32.mrf.mxu0 }
 0x19e   : > { %v1247_v59 = vpop.f32.mrf.mxu1  ;;  %v1250_v60 = vmax.f32 %v1245_v56, 0.0  ;;  %v1251_v62 = vpack.c.bf16 %v1249_v57, %v1249_v57 }
 0x1a0   : > { %v1252_v61 = vpack.c.bf16 %v1250_v60, %v1250_v60 }
 0x1a2   : > { %1420 = vmatprep.mubr.bf16.mxu0 %v1252_v61 }
 0x1a3   : > { %1421 = vmatmul.mubr.bf16.vlgmr.msra.gmra.mxu0 %v1251_v62 }
 0x263   : > { %v1720_v63 = vpop.f32.mrf.mxu0 }
 0x265   : > { %v1721_v1 = vpop.f32.mrf.mxu0 }
 0x266   : > { %v1722_v2 = vadd.f32 %v1721_v1, %v1720_v63 }
 0x267   : > { %v1723_v3 = vpop.f32.mrf.mxu0 }
 0x268   : > { %v1423_v4 = vadd.f32 %v1722_v2, %v1682_v0 }
 0x269   : > { %v1724_v5 = vpop.f32.mrf.mxu0 }
 0x26a   : > { %v1428_v6 = vpack.c.bf16 %v1423_v4, %v1423_v4 }
 0x26c   : > { %1429 = vst [vmem:[%s271_s9] sm:$0xf] %v1428_v6 }
 0x26d   : > { %2106 = shalt.err (!%p2103_p9)
}
 0x26e   : > { %s2107_s26 = scalar_lea.hbm %s1442_s12, 64  ;;  %s2111_s13 = scalar_lea.hbm %s2402_s6, 128 }
 0x26f   : > { %p2108_p13 = scmp.ne.s32.totalorder %s1442_s12, %s2107_s26  ;;  %p2112_p0 = scmp.lt.s32.totalorder %s1442_s12, %s2402_s6 }
 0x270   : > { %p2113_p4 = scmp.lt.s32.totalorder %s2111_s13, %s2107_s26 }
 0x271   : > { %p2109_p5 = pnand %p2108_p13, %p2418_p11 }
 0x272   : > { %p2114_p8 = por %p2113_p4, %p2112_p0 }
 0x273   : > { %p2110_p10 = pneg %p2109_p5 }
 0x275   : > { %p2115_p7 = pnand %p2114_p8, %p2110_p10 }
 0x277   : > { %2118 = shalt.err (!%p2115_p7)
}
 0x278   : > { %1736 = dma.vmem_to_hbm [thread:$0]  (%p2418_p11), %s1445_s10, 64, %s1442_s12, %s1431_s14  }
 0x279 PF: > { %s1456_s17 = sand.u32 1, %s2149_s0   ;;  %p2419_p1 = scmp.ne.s32.totalorder %s2408_s27, 0 }
 0x27a   : > { %p2420_p2 = scmp.ge.s32.totalorder %s2161_s23, 2  ;;  %s1457_s9 = scalar_lea.sflag [#allocation6], %s1456_s17 }
 0x27c   : > { %p1750_p6 = pnand %p2420_p2, %p2419_p1 }
 0x27e   : > { %p1751_p12 = pneg %p1750_p6 }
 0x280   : > { %2144 = dma.done.wait (%p1751_p12), %s1457_s9, 64  }
 0x281   : > { %2146 = vsyncadd (%p1751_p12), %s1457_s9, 4294967232  ;;  %p21_p3 = scmp.ge.s32.totalorder %s2278_s20, 4   ;;  %s2421_s0 = smov %s2153_s21 }
 0x282   : > { %s2422_s21 = smov %s2157_s22  ;;  %s2423_s22 = smov %s2287_s30 }
 0x283   : > { %s2424_s23 = smov %s2278_s20  ;;  %23 = sbr.rel (!%p21_p3) target bundleno = 6 (0x6), region = 93 }
 0x288   :  { %1462 = vsyncpa [#allocation5], 1 }
 0x289   :  { %1464 = vsyncpa [#allocation5 + $0x1], 1 }
 0x28a   :  { %1465 = vsyncpa [#allocation8], 1 }
 0x28b   :  { %1466 = vsyncpa [#allocation6], 1 }
 0x28c   :  { %1468 = vsyncpa [#allocation6 + $0x1], 1 }

</bundles_post_ra>
